<compile_context>
chip_gen: v5e
topology: v5e:2x2
jax: 0.10.0
libtpu: 0.0.40
codegen_flags: <defaults>
</compile_context>

<pallas_src>
import jax
import jax.numpy as jnp
from jax.experimental import pallas as pl
from jax.experimental.pallas import tpu as pltpu


def linear_kernel(x_ref, w_ref, b_ref, o_ref):
    # x_ref : (B, K)   activations
    # w_ref : (K, N)   weight in canonical (in, out) layout
    # b_ref : (1, N)   bias row
    # o_ref : (B, N)   output
    acc = jnp.dot(x_ref[...], w_ref[...], preferred_element_type=jnp.float32)
    o_ref[...] = (acc + b_ref[...]).astype(o_ref.dtype)


def prepare_params(weight, bias):
    """One-time parameter prep (call at init, NOT per forward).

    weight: (output_size, input_size) float32   (native PyTorch layout)
    bias:   (output_size,) float32
    returns (w_t, b_row) with w_t: (input_size, output_size), b_row: (1, output_size)
    """
    w_t = jnp.transpose(jnp.asarray(weight))          # (K, N)
    b_row = jnp.asarray(bias).reshape(1, -1)          # (1, N)
    return w_t, b_row


@jax.jit
def lr_forward(x, w_t, b_row):
    """Pallas equivalent of nn.Linear(input_size, output_size)(x).

    x:     (B, input_size) float32
    w_t:   (input_size, output_size) float32   (pre-transposed, see prepare_params)
    b_row: (1, output_size) float32
    returns (B, output_size) float32
    """
    B, K = x.shape
    K2, N = w_t.shape
    assert K == K2, "input_size mismatch"
    assert b_row.shape == (1, N), "bias shape mismatch"

    out = pl.pallas_call(
        linear_kernel,
        out_shape=jax.ShapeDtypeStruct((B, N), x.dtype),
        # No grid: single invocation, whole arrays in VMEM, no pipeline machinery.
        # Full-array BlockSpecs sidestep the (8,128) block divisibility rule.
        in_specs=[
            pl.BlockSpec(memory_space=pltpu.MemorySpace.VMEM),
            pl.BlockSpec(memory_space=pltpu.MemorySpace.VMEM),
            pl.BlockSpec(memory_space=pltpu.MemorySpace.VMEM),
        ],
        out_specs=pl.BlockSpec(memory_space=pltpu.MemorySpace.VMEM),
    )(x, w_t, b_row)

    # TODO(synk): if this layer is ever scaled up (large B), tile only the batch
    # axis: grid=(pl.cdiv(B, 512),), blocks (512, K) / (512, N) with the weight
    # and bias kept fully resident, and mark the B axis "parallel" (v7x has
    # 2 TCs and only 64 MiB VMEM per TC; v5e/v6e can afford 1024-2048 row tiles).
    # Once B/K/N grow, also cast x / w_t to bfloat16 (keep f32 accumulate).
    return out


if __name__ == "__main__":
    # Small shapes implied by the module: LR(input_size=32, output_size=16), batch=8.
    B, input_size, output_size = 8, 32, 16

    key = jax.random.PRNGKey(0)
    kx, kw, kb = jax.random.split(key, 3)

    x = jax.random.normal(kx, (B, input_size), dtype=jnp.float32)

    # Deterministic parameter init mimicking nn.Linear's uniform(-1/sqrt(in), 1/sqrt(in)).
    bound = 1.0 / jnp.sqrt(jnp.float32(input_size))
    weight = jax.random.uniform(kw, (output_size, input_size),
                                minval=-bound, maxval=bound, dtype=jnp.float32)
    bias = jax.random.uniform(kb, (output_size,),
                              minval=-bound, maxval=bound, dtype=jnp.float32)

    # One-time parameter prep (outside the jitted forward path).
    w_t, b_row = prepare_params(weight, bias)
    w_t, b_row = jax.block_until_ready((w_t, b_row))

    out = jax.block_until_ready(lr_forward(x, w_t, b_row))

    # Correctness check against plain-JAX reference.
    ref = x @ weight.T + bias
    assert out.shape == (B, output_size)
    assert jnp.allclose(out, ref, atol=1e-5, rtol=1e-5)

    print("KERNEL_OK")
</pallas_src>

<mosaic_0001>
module attributes {stable_mosaic.version = 11 : i64} {
  func.func @linear_kernel(%arg0: memref<8x32xf32, #tpu.memory_space<vmem>>, %arg1: memref<32x16xf32, #tpu.memory_space<vmem>>, %arg2: memref<1x16xf32, #tpu.memory_space<vmem>>, %arg3: memref<8x16xf32, #tpu.memory_space<vmem>>) attributes {dimension_semantics = [], scalar_prefetch = 0 : i64, scratch_operands = 0 : i64, tpu.core_type = #tpu.core_type<tc>} {
    %c0 = arith.constant 0 : index
    %c0_0 = arith.constant 0 : index
    %0 = vector.load %arg0[%c0, %c0_0] : memref<8x32xf32, #tpu.memory_space<vmem>>, vector<8x32xf32>
    %c0_1 = arith.constant 0 : index
    %c0_2 = arith.constant 0 : index
    %1 = vector.load %arg1[%c0_1, %c0_2] : memref<32x16xf32, #tpu.memory_space<vmem>>, vector<32x16xf32>
    %cst = arith.constant dense<0.000000e+00> : vector<8x16xf32>
    %2 = tpu.matmul %0, %1, %cst {dimension_numbers = #tpu.dot_dimension_numbers<[1], [0], [0], [1], [0, 0, 1, 1], [], []>} : vector<8x32xf32>, vector<32x16xf32>, vector<8x16xf32> -> vector<8x16xf32>
    %c0_3 = arith.constant 0 : index
    %c0_4 = arith.constant 0 : index
    %3 = vector.load %arg2[%c0_3, %c0_4] : memref<1x16xf32, #tpu.memory_space<vmem>>, vector<1x16xf32>
    %4 = vector.broadcast %3 : vector<1x16xf32> to vector<8x16xf32>
    %5 = arith.addf %2, %4 : vector<8x16xf32>
    %c0_5 = arith.constant 0 : index
    %c0_6 = arith.constant 0 : index
    %6 = vector.load %arg3[%c0_5, %c0_6] : memref<8x16xf32, #tpu.memory_space<vmem>>, vector<8x16xf32>
    tpu.vector_store %arg3[%c0_5, %c0_6], %5 {strides = array<i32>} : memref<8x16xf32, #tpu.memory_space<vmem>>, vector<8x16xf32>,
    return
  }
}

</mosaic_0001>

<bundles_post_ra>
// kernel: lr_forward.1
= control target key start
LH: loop header
LB: loop body
LE: loop exit
PB: predicated region body
PF: predicated region fallthrough
CT: control target
= control target key end

     0   :  { %s137_s0 = inlined_call_operand.vmem [shape: f32[8,32], index: 0, kind: input, shape index: {}]   ;;  %s138_s1 = inlined_call_operand.vmem [shape: f32[32,16], index: 1, kind: input, shape index: {}]   ;;  %s139_s2 = inlined_call_operand.vmem [shape: f32[1,16], index: 2, kind: input, shape index: {}]   ;;  %s140_s3 = inlined_call_operand.hbm [shape: f32[8,16], index: 3, kind: output, shape index: {}]  }
   0x1   :  { %v19_v0 = vld [vmem:[%s138_s1 + $0x18] sm:$0xff]  ;;  %v18_v1 = vld [vmem:[%s138_s1 + $0x10] sm:$0xff]  ;;  %v17_v2 = vld [vmem:[%s138_s1 + $0x8] sm:$0xff] }
   0x2   :  { %40 = vmatpush.msra.mxu0 %v19_v0 }
   0x3   :  { %8 = vsyncpa [#allocation3], 0  ;;  %v16_v3 = vld [vmem:[%s138_s1] sm:$0xff]  ;;  %vm24_vm0 = vcmask 261120   ;;  %s95_s24 = smov [#allocation2]   ;;  %s57_s28 = sshll.u32 %s140_s3, 4  ;;  %s58_s28 = int_to_ptr.hbm [resolvable:$true] %s57_s28 }
   0x4   :  { %41 = vmatpush.msra.mxu0 %v18_v1  ;;  %v15_v4 = vld [vmem:[%s137_s0] sm:$0xff]  ;;  %s55_s25 = sshll.u32 %s95_s24, 4  ;;  %vm48_vm1 = vcmask 130048   ;;  %s56_s25 = int_to_ptr.vmem [resolvable:$true] %s55_s25 }
   0x5   :  { %v68_v5 = vld [vmem:[%s139_s2] ss:$0 sm:$0xff] }
   0x6   :  { %42 = vmatpush.msra.mxu0 %v17_v2 }
   0x8   :  { %43 = vmatpush.msra.mxu0 %v16_v3 }
   0x9   :  { %66 = vmatmul.msk.f32.vlgmr.msra.gmra.mxu0 %vm24_vm0, %v15_v4 }
  0x86   :  { %v45_v6 = vpop.f32.mrf.mxu0 }
  0x87   :  { %v46_v7 = vadd.f32 %v68_v5, %v45_v6 }
  0x89   :  { %49 = vst.msk [vmem:[#allocation2] sm:$0xff] %vm48_vm1, %v46_v7 }
  0x8a   :  { %60 = dma.vmem_to_hbm [thread:$0]  %s56_s25, 128, %s58_s28, [#allocation3]  }
  0x8b   :  { %93 = dma.done.wait [#allocation3], 128  }
  0x8c   :  { %94 = vsyncadd [#allocation3], 4294967168 }
  0x8d   :  { %65 = vsyncpa [#allocation3], 1 }

</bundles_post_ra>
